<compile_context>
chip_gen: v7x
topology: tpu7x:2x2x1
jax: 0.10.0
libtpu: 0.0.40
codegen_flags: <defaults>
</compile_context>

<pallas_src>
import functools

import jax
import jax.numpy as jnp
from jax.experimental import pallas as pl
from jax.experimental.pallas import tpu as pltpu

EMB_DIM = 3
N_CLASSES = 10

_EPS = 1e-07                   # clamp eps from the module's forward()
_NORM_EPS_SQ = 1e-12 * 1e-12   # (torch F.normalize eps)^2, for rsqrt(max(ss,.))
_LOG_CLAMP = -100.0            # torch binary_cross_entropy clamps logs at -100

# acos polynomial (Abramowitz & Stegun 4.4.45) coefficients.  Plain Python
# floats: jnp scalars here become captured constants, which pallas_call
# rejects (this was the compile failure).
_ACOS_C = (1.5707963050, -0.2145988016, 0.0889789874, -0.0501743046,
           0.0308918810, -0.0170881256, 0.0066700901, -0.0012624911)
_PI = 3.14159265358979


def _acos_f32(x):
    """acos(x) = sqrt(1-|x|)*poly(|x|), reflected for x<0 (|abs err| <= 2e-8).

    Estrin evaluation keeps the dependent-FMA chain short; only uses
    mul/add/sqrt/select, all of which lower cleanly in Mosaic (VPU/EUP).
    """
    c0, c1, c2, c3, c4, c5, c6, c7 = _ACOS_C
    ax = jnp.abs(x)
    ax2 = ax * ax
    ax4 = ax2 * ax2
    p01 = c0 + c1 * ax
    p23 = c2 + c3 * ax
    p45 = c4 + c5 * ax
    p67 = c6 + c7 * ax
    p = (p01 + p23 * ax2) + (p45 + p67 * ax2) * ax4
    r = p * jnp.sqrt(jnp.maximum(1.0 - ax, 0.0))
    return jnp.where(x >= 0, r, _PI - r)


def _angular_loss_kernel(tgt_ref, emb_ref, wt_ref, out_ref, *, emb_dim, scale,
                         final_scale):
    emb = emb_ref[...]          # (B, D)  f32, D = EMB_DIM (unpadded)
    wt = wt_ref[...]            # (D, C)  f32, weight^T prepared once
    tgt = tgt_ref[...]          # (B, 1)  i32

    # --- raw dot product: K = D = 3 -> broadcast-FMAs on (B, C), no MXU -----
    raw = emb[:, 0:1] * wt[0:1, :]                               # (B, C)
    for d in range(1, emb_dim):
        raw = raw + emb[:, d:d + 1] * wt[d:d + 1, :]

    # --- normalize the product, not the operands ----------------------------
    # 1/max(||x||, 1e-12) == rsqrt(max(sum(x^2), 1e-24)): one EUP rsqrt per
    # row / per class instead of per-element divides on both operands.
    emb_ss = jnp.sum(emb * emb, axis=1, keepdims=True)           # (B, 1)
    w_ss = jnp.sum(wt * wt, axis=0, keepdims=True)               # (1, C)
    inv_norm = (jax.lax.rsqrt(jnp.maximum(emb_ss, _NORM_EPS_SQ))
                * jax.lax.rsqrt(jnp.maximum(w_ss, _NORM_EPS_SQ)))
    cosine = jnp.clip(raw * inv_norm, -1.0 + _EPS, 1.0 - _EPS)   # (B, C)

    b, c = cosine.shape
    class_ids = jax.lax.broadcasted_iota(jnp.int32, (b, c), 1)
    one_hot = (class_ids == tgt).astype(jnp.float32)    # scatter_ equivalent

    # --- 'simpleface' logits: -acos(cosine) ---------------------------------
    logits = -_acos_f32(cosine)
    # TODO(synk): 'arcface' branch (cos(angles + margin) blend) not emitted;
    # the reference instance uses logits='simpleface'.

    # --- fused log-softmax over classes --------------------------------------
    z = logits if scale == 1.0 else logits * scale
    z = z - jnp.max(z, axis=1, keepdims=True)
    e = jnp.exp(z)
    sum_e = jnp.sum(e, axis=1, keepdims=True)                    # (B, 1)
    log_p = jnp.maximum(z - jnp.log(sum_e), _LOG_CLAMP)          # log(probs)
    probs = e * pl.reciprocal(sum_e, approx=False)               # only for 1-p

    # --- binary cross entropy (mean reduction, logs clamped at -100) --------
    log_1mp = jnp.maximum(jnp.log(1.0 - probs), _LOG_CLAMP)
    bce = -(one_hot * log_p + (1.0 - one_hot) * log_1mp)

    # final_scale = num_identities / (B * C), folded at trace time.
    out_ref[0, 0] = jnp.sum(bce) * final_scale


def prepare_weight(weight):
    """One-time parameter prep (at init, NOT per loss call): f32 + (D, C).

    No padding: the kernel contracts the tiny D axis with broadcast-FMAs.
    """
    return jnp.transpose(weight.astype(jnp.float32))             # (D, C)


@functools.partial(jax.jit, static_argnames=("scale",))
def angular_loss(embeddings, targets, weight_t, *, scale=1.0):
    """Forward of AngularLoss(EMB_DIM, N_CLASSES, logits='simpleface').

    embeddings: (B, D) float, targets: (B,) int, weight_t: (D, C) from
    prepare_weight.  Returns BCE(softmax(-acos(cos)), one_hot) * C,
    matching the PyTorch module.
    """
    b, d = embeddings.shape
    d2, c = weight_t.shape
    assert d == d2, (d, d2)
    tgt = targets.astype(jnp.int32).reshape(b, 1)

    kernel = functools.partial(
        _angular_loss_kernel,
        emb_dim=d,
        scale=float(scale),
        final_scale=float(c) / float(b * c))

    out = pl.pallas_call(
        kernel,
        out_shape=jax.ShapeDtypeStruct((1, 1), jnp.float32),
        in_specs=[
            pl.BlockSpec(memory_space=pltpu.MemorySpace.VMEM),  # targets (B,1)
            pl.BlockSpec(memory_space=pltpu.MemorySpace.VMEM),  # embeddings
            pl.BlockSpec(memory_space=pltpu.MemorySpace.VMEM),  # weight^T
        ],
        out_specs=pl.BlockSpec(memory_space=pltpu.MemorySpace.SMEM),
    )(tgt, embeddings.astype(jnp.float32), weight_t)
    return out[0, 0]


def _reference(embeddings, targets, weight, *, scale=1.0):
    """Pure-JAX mirror of the PyTorch forward (sanity check only)."""
    emb_n = embeddings / jnp.maximum(
        jnp.linalg.norm(embeddings, axis=1, keepdims=True), 1e-12)
    w_n = weight / jnp.maximum(
        jnp.linalg.norm(weight, axis=1, keepdims=True), 1e-12)
    cosine = jnp.clip(emb_n @ w_n.T, -1.0 + _EPS, 1.0 - _EPS)
    one_hot = jax.nn.one_hot(targets, weight.shape[0], dtype=jnp.float32)
    probs = jax.nn.softmax(scale * (-jnp.arccos(cosine)), axis=1)
    bce = -(one_hot * jnp.maximum(jnp.log(probs), _LOG_CLAMP)
            + (1.0 - one_hot) * jnp.maximum(jnp.log(1.0 - probs), _LOG_CLAMP))
    return jnp.mean(bce) * weight.shape[0]


if __name__ == "__main__":
    key = jax.random.PRNGKey(0)
    k_w, k_e, k_t = jax.random.split(key, 3)

    B = 8
    # Parameter from __init__: torch.randn(num_identities, dimension)
    weight = jax.random.normal(k_w, (N_CLASSES, EMB_DIM), dtype=jnp.float32)
    embeddings = jax.random.normal(k_e, (B, EMB_DIM), dtype=jnp.float32)
    targets = jax.random.randint(k_t, (B,), 0, N_CLASSES, dtype=jnp.int32)

    weight_t = prepare_weight(weight)            # (D, C), one-time prep

    loss = angular_loss(embeddings, targets, weight_t, scale=1.0)
    loss = jax.block_until_ready(loss)

    ref = _reference(embeddings, targets, weight, scale=1.0)
    assert jnp.allclose(loss, ref, rtol=1e-5, atol=1e-5), (loss, ref)

    print("KERNEL_OK")
</pallas_src>

<mosaic_0001>
module attributes {stable_mosaic.version = 11 : i64} {
  func.func @_angular_loss_kernel(%arg0: memref<8x1xi32, #tpu.memory_space<vmem>>, %arg1: memref<8x3xf32, #tpu.memory_space<vmem>>, %arg2: memref<3x10xf32, #tpu.memory_space<vmem>>, %arg3: memref<1x1xf32, #tpu.memory_space<smem>>) attributes {dimension_semantics = [], scalar_prefetch = 0 : i64, scratch_operands = 0 : i64, tpu.core_type = #tpu.core_type<tc>} {
    %c0 = arith.constant 0 : index
    %c0_0 = arith.constant 0 : index
    %0 = vector.load %arg1[%c0, %c0_0] : memref<8x3xf32, #tpu.memory_space<vmem>>, vector<8x3xf32>
    %c0_1 = arith.constant 0 : index
    %c0_2 = arith.constant 0 : index
    %1 = vector.load %arg2[%c0_1, %c0_2] : memref<3x10xf32, #tpu.memory_space<vmem>>, vector<3x10xf32>
    %c0_3 = arith.constant 0 : index
    %c0_4 = arith.constant 0 : index
    %2 = vector.load %arg0[%c0_3, %c0_4] : memref<8x1xi32, #tpu.memory_space<vmem>>, vector<8x1xi32>
    %3 = vector.extract_strided_slice %0 {offsets = [0, 0], sizes = [8, 1], strides = [1, 1]} : vector<8x3xf32> to vector<8x1xf32>
    %4 = vector.extract_strided_slice %1 {offsets = [0, 0], sizes = [1, 10], strides = [1, 1]} : vector<3x10xf32> to vector<1x10xf32>
    %5 = vector.broadcast %3 : vector<8x1xf32> to vector<8x10xf32>
    %6 = vector.broadcast %4 : vector<1x10xf32> to vector<8x10xf32>
    %7 = arith.mulf %5, %6 : vector<8x10xf32>
    %8 = vector.extract_strided_slice %0 {offsets = [0, 1], sizes = [8, 1], strides = [1, 1]} : vector<8x3xf32> to vector<8x1xf32>
    %9 = vector.extract_strided_slice %1 {offsets = [1, 0], sizes = [1, 10], strides = [1, 1]} : vector<3x10xf32> to vector<1x10xf32>
    %10 = vector.broadcast %8 : vector<8x1xf32> to vector<8x10xf32>
    %11 = vector.broadcast %9 : vector<1x10xf32> to vector<8x10xf32>
    %12 = arith.mulf %10, %11 : vector<8x10xf32>
    %13 = arith.addf %7, %12 : vector<8x10xf32>
    %14 = vector.extract_strided_slice %0 {offsets = [0, 2], sizes = [8, 1], strides = [1, 1]} : vector<8x3xf32> to vector<8x1xf32>
    %15 = vector.extract_strided_slice %1 {offsets = [2, 0], sizes = [1, 10], strides = [1, 1]} : vector<3x10xf32> to vector<1x10xf32>
    %16 = vector.broadcast %14 : vector<8x1xf32> to vector<8x10xf32>
    %17 = vector.broadcast %15 : vector<1x10xf32> to vector<8x10xf32>
    %18 = arith.mulf %16, %17 : vector<8x10xf32>
    %19 = arith.addf %13, %18 : vector<8x10xf32>
    %20 = arith.mulf %0, %0 : vector<8x3xf32>
    %cst = arith.constant dense<0.000000e+00> : vector<8xf32>
    %21 = vector.multi_reduction <add>, %20, %cst [1] : vector<8x3xf32> to vector<8xf32>
    %22 = vector.shape_cast %21 : vector<8xf32> to vector<8x1xf32>
    %23 = arith.mulf %1, %1 : vector<3x10xf32>
    %cst_5 = arith.constant dense<0.000000e+00> : vector<10xf32>
    %24 = vector.multi_reduction <add>, %23, %cst_5 [0] : vector<3x10xf32> to vector<10xf32>
    %25 = vector.shape_cast %24 : vector<10xf32> to vector<1x10xf32>
    %cst_6 = arith.constant 1.000000e-24 : f32
    %26 = vector.broadcast %cst_6 : f32 to vector<8x1xf32>
    %27 = arith.maximumf %22, %26 : vector<8x1xf32>
    %28 = math.rsqrt %27 : vector<8x1xf32>
    %cst_7 = arith.constant 1.000000e-24 : f32
    %29 = vector.broadcast %cst_7 : f32 to vector<1x10xf32>
    %30 = arith.maximumf %25, %29 : vector<1x10xf32>
    %31 = math.rsqrt %30 : vector<1x10xf32>
    %32 = vector.broadcast %28 : vector<8x1xf32> to vector<8x10xf32>
    %33 = vector.broadcast %31 : vector<1x10xf32> to vector<8x10xf32>
    %34 = arith.mulf %32, %33 : vector<8x10xf32>
    %35 = arith.mulf %19, %34 : vector<8x10xf32>
    %cst_8 = arith.constant -0.99999988 : f32
    %cst_9 = arith.constant 0.99999988 : f32
    %36 = vector.broadcast %cst_8 : f32 to vector<8x10xf32>
    %37 = arith.maximumf %36, %35 : vector<8x10xf32>
    %38 = vector.broadcast %cst_9 : f32 to vector<8x10xf32>
    %39 = arith.minimumf %38, %37 : vector<8x10xf32>
    %40 = tpu.iota {dimensions = array<i32: 1>} : vector<8x10xi32>
    %41 = vector.broadcast %2 : vector<8x1xi32> to vector<8x10xi32>
    %42 = arith.cmpi eq, %40, %41 : vector<8x10xi32>
    %43 = arith.extui %42 : vector<8x10xi1> to vector<8x10xi32>
    %44 = arith.sitofp %43 : vector<8x10xi32> to vector<8x10xf32>
    %45 = math.absf %39 : vector<8x10xf32>
    %46 = arith.mulf %45, %45 : vector<8x10xf32>
    %47 = arith.mulf %46, %46 : vector<8x10xf32>
    %cst_10 = arith.constant -0.214598805 : f32
    %48 = vector.broadcast %cst_10 : f32 to vector<8x10xf32>
    %49 = arith.mulf %48, %45 : vector<8x10xf32>
    %cst_11 = arith.constant 1.57079625 : f32
    %50 = vector.broadcast %cst_11 : f32 to vector<8x10xf32>
    %51 = arith.addf %50, %49 : vector<8x10xf32>
    %cst_12 = arith.constant -0.0501743034 : f32
    %52 = vector.broadcast %cst_12 : f32 to vector<8x10xf32>
    %53 = arith.mulf %52, %45 : vector<8x10xf32>
    %cst_13 = arith.constant 0.0889789909 : f32
    %54 = vector.broadcast %cst_13 : f32 to vector<8x10xf32>
    %55 = arith.addf %54, %53 : vector<8x10xf32>
    %cst_14 = arith.constant -0.0170881264 : f32
    %56 = vector.broadcast %cst_14 : f32 to vector<8x10xf32>
    %57 = arith.mulf %56, %45 : vector<8x10xf32>
    %cst_15 = arith.constant 0.0308918804 : f32
    %58 = vector.broadcast %cst_15 : f32 to vector<8x10xf32>
    %59 = arith.addf %58, %57 : vector<8x10xf32>
    %cst_16 = arith.constant -0.0012624911 : f32
    %60 = vector.broadcast %cst_16 : f32 to vector<8x10xf32>
    %61 = arith.mulf %60, %45 : vector<8x10xf32>
    %cst_17 = arith.constant 6.670090e-03 : f32
    %62 = vector.broadcast %cst_17 : f32 to vector<8x10xf32>
    %63 = arith.addf %62, %61 : vector<8x10xf32>
    %64 = arith.mulf %55, %46 : vector<8x10xf32>
    %65 = arith.addf %51, %64 : vector<8x10xf32>
    %66 = arith.mulf %63, %46 : vector<8x10xf32>
    %67 = arith.addf %59, %66 : vector<8x10xf32>
    %68 = arith.mulf %67, %47 : vector<8x10xf32>
    %69 = arith.addf %65, %68 : vector<8x10xf32>
    %cst_18 = arith.constant 1.000000e+00 : f32
    %70 = vector.broadcast %cst_18 : f32 to vector<8x10xf32>
    %71 = arith.subf %70, %45 : vector<8x10xf32>
    %cst_19 = arith.constant 0.000000e+00 : f32
    %72 = vector.broadcast %cst_19 : f32 to vector<8x10xf32>
    %73 = arith.maximumf %71, %72 : vector<8x10xf32>
    %74 = math.sqrt %73 : vector<8x10xf32>
    %75 = arith.mulf %69, %74 : vector<8x10xf32>
    %cst_20 = arith.constant 0.000000e+00 : f32
    %76 = vector.broadcast %cst_20 : f32 to vector<8x10xf32>
    %77 = arith.cmpf oge, %39, %76 : vector<8x10xf32>
    %cst_21 = arith.constant 3.14159274 : f32
    %78 = vector.broadcast %cst_21 : f32 to vector<8x10xf32>
    %79 = arith.subf %78, %75 : vector<8x10xf32>
    %80 = arith.select %77, %75, %79 : vector<8x10xi1>, vector<8x10xf32>
    %cst_22 = arith.constant 0.000000e+00 : f32
    %81 = vector.broadcast %cst_22 : f32 to vector<8x10xf32>
    %82 = arith.subf %81, %80 : vector<8x10xf32>
    %cst_23 = arith.constant dense<0xFF800000> : vector<8xf32>
    %83 = vector.multi_reduction <maximumf>, %82, %cst_23 [1] : vector<8x10xf32> to vector<8xf32>
    %84 = vector.shape_cast %83 : vector<8xf32> to vector<8x1xf32>
    %85 = vector.broadcast %84 : vector<8x1xf32> to vector<8x10xf32>
    %86 = arith.subf %82, %85 : vector<8x10xf32>
    %87 = math.exp %86 : vector<8x10xf32>
    %cst_24 = arith.constant dense<0.000000e+00> : vector<8xf32>
    %88 = vector.multi_reduction <add>, %87, %cst_24 [1] : vector<8x10xf32> to vector<8xf32>
    %89 = vector.shape_cast %88 : vector<8xf32> to vector<8x1xf32>
    %90 = math.log %89 : vector<8x1xf32>
    %91 = vector.broadcast %90 : vector<8x1xf32> to vector<8x10xf32>
    %92 = arith.subf %86, %91 : vector<8x10xf32>
    %cst_25 = arith.constant -1.000000e+02 : f32
    %93 = vector.broadcast %cst_25 : f32 to vector<8x10xf32>
    %94 = arith.maximumf %92, %93 : vector<8x10xf32>
    %95 = tpu.reciprocal %89 : vector<8x1xf32> -> vector<8x1xf32>
    %96 = vector.broadcast %95 : vector<8x1xf32> to vector<8x10xf32>
    %97 = arith.mulf %87, %96 : vector<8x10xf32>
    %cst_26 = arith.constant 1.000000e+00 : f32
    %98 = vector.broadcast %cst_26 : f32 to vector<8x10xf32>
    %99 = arith.subf %98, %97 : vector<8x10xf32>
    %100 = math.log %99 : vector<8x10xf32>
    %cst_27 = arith.constant -1.000000e+02 : f32
    %101 = vector.broadcast %cst_27 : f32 to vector<8x10xf32>
    %102 = arith.maximumf %100, %101 : vector<8x10xf32>
    %103 = arith.mulf %44, %94 : vector<8x10xf32>
    %cst_28 = arith.constant 1.000000e+00 : f32
    %104 = vector.broadcast %cst_28 : f32 to vector<8x10xf32>
    %105 = arith.subf %104, %44 : vector<8x10xf32>
    %106 = arith.mulf %105, %102 : vector<8x10xf32>
    %107 = arith.addf %103, %106 : vector<8x10xf32>
    %cst_29 = arith.constant 0.000000e+00 : f32
    %108 = vector.broadcast %cst_29 : f32 to vector<8x10xf32>
    %109 = arith.subf %108, %107 : vector<8x10xf32>
    %110 = vector.shape_cast %109 : vector<8x10xf32> to vector<1x8x10xf32>
    %cst_30 = arith.constant dense<0.000000e+00> : vector<1xf32>
    %111 = vector.multi_reduction <add>, %110, %cst_30 [1, 2] : vector<1x8x10xf32> to vector<1xf32>
    %112 = vector.shape_cast %111 : vector<1xf32> to vector<1x1x1xf32>
    %113 = vector.extract %112[0, 0, 0] : f32 from vector<1x1x1xf32>
    %cst_31 = arith.constant 1.250000e-01 : f32
    %114 = arith.mulf %113, %cst_31 : f32
    %c0_32 = arith.constant 0 : index
    %c0_33 = arith.constant 0 : index
    %115 = memref.load %arg3[%c0_32, %c0_33] : memref<1x1xf32, #tpu.memory_space<smem>>
    memref.store %114, %arg3[%c0_32, %c0_33] : memref<1x1xf32, #tpu.memory_space<smem>>
    return
  }
}

</mosaic_0001>

<bundles_post_ra>
// kernel: angular_loss.1
= control target key start
LH: loop header
LB: loop body
LE: loop exit
PB: predicated region body
PF: predicated region fallthrough
CT: control target
= control target key end

     0   :  { %vm49_vm0 = vcmask 23552   ;;  %v198_v2 = vmov 1   ;;  %v199_v3 = vmov 0   ;;  %s249_s0 = inlined_call_operand.vmem [shape: s32[8,1], index: 0, kind: input, shape index: {}]   ;;  %s250_s1 = inlined_call_operand.vmem [shape: f32[8,3], index: 1, kind: input, shape index: {}]   ;;  %s251_s2 = inlined_call_operand.vmem [shape: f32[3,10], index: 2, kind: input, shape index: {}]   ;;  %s252_s3 = inlined_call_operand.hbm [shape: f32[1,1], index: 3, kind: output, shape index: {}]  }
   0x1   :  { %v15_v0 = vld [vmem:[%s250_s1] sm:$0xff]  ;;  %170 = vset.pattern.permute.xlu1 %v198_v2  ;;  %169 = vset.pattern.permute.xlu0 %v199_v3 }
   0x2   :  { %v48_v1 = vmul.f32 %v15_v0, %v15_v0 }
   0x3   :  { %8 = vsyncpa [#allocation3], 0  ;;  %29 = vperm.xlu1 %170, %v15_v0   ;;  %v200_v5 = vmov 2   ;;  %v17_v6 = vld [vmem:[%s249_s0] sm:$0xff]  ;;  %vm54_vm1 = vcmask 75776   ;;  %v23_v15 = vlaneseq  ;;  %vm109_vm5 = vcmask 80896  }
   0x4   :  { %v50_v4 = vsel %vm49_vm0, %v48_v1, 0.0  ;;  %v16_v7 = vld [vmem:[%s251_s2] sm:$0x7]  ;;  %s186_s19 = scalar_lea.hbm %s252_s3, 16 }
   0x5   :  { %51 = vadd.xlane.f32.xlu0 %v50_v4  ;;  %v53_v8 = vmul.f32 %v16_v7, %v16_v7  ;;  %v24_v17 = vshrl.u32 %v23_v15, 7  ;;  %p187_p0 = scmp.ne.s32.totalorder %s252_s3, %s186_s19  ;;  %p190_p1 = scmp.lt.u32.totalorder %s186_s19, %s252_s3 }
   0x7   :  { %171 = vset.pattern.permute.xlu1 %v200_v5  ;;  %v55_v9 = vsel %vm54_vm1, %v53_v8, 0.0  ;;  %v34_v20 = vsub.s32 1, %v24_v17  ;;  %v25_v23 = vsub.s32 0, %v24_v17  ;;  %v44_v24 = vsub.s32 2, %v24_v17  ;;  %p192_p2 = pnand %p190_p1, %p187_p0 }
   0x8   :  { %39 = vperm.xlu1 %171, %v15_v0   ;;  %v56_v10 = vrot.slane %v55_v9, 4 }
   0x9   :  { %v35_v25 = vrot.slane %v16_v7, %v34_v20  ;;  %v26_v26 = vrot.slane %v16_v7, %v25_v23  ;;  %v45_v27 = vrot.slane %v16_v7, %v44_v24 }
   0xa   :  { %v57_v11 = vadd.f32 %v56_v10, %v55_v9 }
   0xc   :  { %v58_v12 = vrot.slane %v57_v11, 2 }
   0xe   :  { %v59_v13 = vadd.f32 %v58_v12, %v57_v11 }
  0x10   :  { %v60_v14 = vrot.slane %v59_v13, 1 }
  0x12   :  { %v61_v16 = vadd.f32 %v60_v14, %v59_v13 }
  0x14   :  { %v64_v18 = vmax.f32 %v61_v16, 1e-24  ;;  %v71_v16 = vand.u32 127, %v23_v15 }
  0x16   :  { %172 = vrsqrt.f32 %v64_v18 }
  0x1b   :  { %20 = vperm.xlu0 %169, %v15_v0  }
  0x1f   :  { %73 = vperm.xlu0 %169, %v17_v6  }
  0x20   :  { %v173_v33 = vpop.eup %172 }
  0x82   :  { %v30_v21 = vpop.permute.xlu1 %29 }
  0x83   :  { %v36_v30 = vmul.f32 %v35_v25, %v30_v21  ;;  %v201_v21 = vmov 0.0  }
  0x87   :  { %v40_v28 = vpop.permute.xlu1 %39 }
  0x88   :  { %v46_v32 = vmul.f32 %v45_v27, %v40_v28 }
  0x92   :  { %v52_v19 = vpop.xlane.xlu0 %51 }
  0x93   :  { %v62_v22 = vmax.f32 %v52_v19, 1e-24 }
  0x95   :  { %174 = vrsqrt.f32 %v62_v22 }
  0x9a   :  { %v21_v29 = vpop.permute.xlu0 %20 }
  0x9b   :  { %v27_v31 = vmul.f32 %v26_v26, %v21_v29 }
  0x9d   :  { %v37_v34 = vadd.f32 %v36_v30, %v27_v31 }
  0x9e   :  { %v74_v18 = vpop.permute.xlu0 %73 }
  0x9f   :  { %v175_v35 = vpop.eup %174  ;;  %v47_v36 = vadd.f32 %v46_v32, %v37_v34  ;;  %vm75_vm6 = vcmp.eq.s32.totalorder %v71_v16, %v74_v18 }
  0xa0   :  { %v66_v37 = vmul.f32 %v175_v35, %v173_v33  ;;  %v161_v22 = vsel %vm75_vm6, 1.0, %v201_v21 }
  0xa1   :  { %v130_v25 = vsub.f32 1.0, %v161_v22 }
  0xa2   :  { %v67_v38 = vmul.f32 %v66_v37, %v47_v36 }
  0xa4   :  { %v160_v39 = vclamps-f32 %v67_v38, 0.9999999 }
  0xa6   :  { %v78_v40 = vand.u32 2147483647, %v160_v39  ;;  %vm105_vm4 = vcmp.ge.f32.partialorder %v160_v39, 0.0 }
  0xa8   :  { %v95_v41 = vsub.f32 1.0, %v78_v40  ;;  %v87_v42 = vmul.f32 -0.0012624911, %v78_v40  ;;  %v79_v44 = vmul.f32 %v78_v40, %v78_v40  ;;  %v83_v45 = vmul.f32 -0.050174303, %v78_v40 }
  0xa9   :  { %v85_v46 = vmul.f32 -0.017088126, %v78_v40  ;;  %v81_v51 = vmul.f32 -0.2145988, %v78_v40 }
  0xaa   :  { %v96_v43 = vmax.f32 %v95_v41, 0.0  ;;  %v88_v47 = vadd.f32 0.00667009, %v87_v42  ;;  %v84_v49 = vadd.f32 0.08897899, %v83_v45  ;;  %v80_v53 = vmul.f32 %v79_v44, %v79_v44 }
  0xab   :  { %v86_v50 = vadd.f32 0.03089188, %v85_v46  ;;  %v82_v55 = vadd.f32 1.5707963, %v81_v51 }
  0xac   :  { %176 = vrsqrt.f32 %v96_v43  ;;  %v91_v48 = vmul.f32 %v88_v47, %v79_v44  ;;  %v89_v54 = vmul.f32 %v84_v49, %v79_v44  ;;  %vm99_vm2 = vcmp.eq.f32.partialorder %v96_v43, inf }
  0xad   :  { %v102_v60 = vand.u32 2147483648, %v96_v43  ;;  %vm101_vm3 = vcmp.eq.f32.partialorder %v96_v43, 0.0 }
  0xae   :  { %v92_v52 = vadd.f32 %v91_v48, %v86_v50  ;;  %v90_v58 = vadd.f32 %v89_v54, %v82_v55 }
  0xb0   :  { %v93_v56 = vmul.f32 %v92_v52, %v80_v53 }
  0xb2   :  { %v94_v61 = vadd.f32 %v93_v56, %v90_v58 }
  0xb6   :  { %v177_v57 = vpop.eup %176 }
  0xb7   :  { %v98_v59 = vmul.f32 %v177_v57, %v96_v43 }
  0xb9   :  { %v100_v62 = vsel %vm99_vm2, %v96_v43, %v98_v59 }
  0xba   :  { %v103_v63 = vsel %vm101_vm3, %v102_v60, %v100_v62 }
  0xbb   :  { %v104_v0 = vmul.f32 %v103_v63, %v94_v61 }
  0xbd   :  { %v106_v1 = vsub.f32 3.1415927, %v104_v0 }
  0xbf   :  { %v107_v2 = vsel %vm105_vm4, %v104_v0, %v106_v1 }
  0xc0   :  { %v108_v3 = vsub.f32 0.0, %v107_v2 }
  0xc2   :  { %v110_v4 = vsel %vm109_vm5, %v108_v3, -inf }
  0xc3   :  { %111 = vmax.xlane.f32.xlu1 %v110_v4 }
 0x150   :  { %v112_v5 = vpop.xlane.xlu1 %111 }
 0x151   :  { %v113_v6 = vsub.f32 %v108_v3, %v112_v5 }
 0x153   :  { %v114_v7 = vmul.f32 1.442695, %v113_v6 }
 0x155   :  { %178 = vpow2.f32 %v114_v7 }
 0x15f   :  { %v179_v8 = vpop.eup %178 }
 0x160   :  { %v116_v9 = vsel %vm109_vm5, %v179_v8, 0.0 }
 0x161   :  { %117 = vadd.xlane.f32.xlu1 %v116_v9 }
 0x1ee   :  { %v118_v10 = vpop.xlane.xlu1 %117 }
 0x1ef   :  { %180 = vrcp.f32 %v118_v10 }
 0x1f0   :  { %182 = vlog2.f32 %v118_v10 }
 0x1f9   :  { %v181_v11 = vpop.eup %180 }
 0x1fa   :  { %v124_v12 = vmul.f32 %v181_v11, %v179_v8  ;;  %v183_v14 = vpop.eup %182 }
 0x1fb   :  { %v120_v17 = vmul.f32 0.6931472, %v183_v14 }
 0x1fc   :  { %v125_v13 = vsub.f32 1.0, %v124_v12 }
 0x1fd   :  { %v121_v19 = vsub.f32 %v113_v6, %v120_v17 }
 0x1fe   :  { %184 = vlog2.f32 %v125_v13 }
 0x1ff   :  { %v122_v23 = vmax.f32 %v121_v19, -100.0 }
 0x201   :  { %v129_v27 = vmul.f32 %v161_v22, %v122_v23 }
 0x208   :  { %v185_v20 = vpop.eup %184 }
 0x209   :  { %v127_v24 = vmul.f32 0.6931472, %v185_v20 }
 0x20b   :  { %v128_v26 = vmax.f32 %v127_v24, -100.0 }
 0x20d   :  { %v131_v28 = vmul.f32 %v130_v25, %v128_v26 }
 0x20f   :  { %v132_v29 = vadd.f32 %v131_v28, %v129_v27 }
 0x211   :  { %v133_v30 = vsub.f32 0.0, %v132_v29 }
 0x213   :  { %v134_v31 = vsel %vm109_vm5, %v133_v30, 0.0 }
 0x214   :  { %135 = vadd.xlane.f32.xlu1 %v134_v31 }
 0x2a1   :  { %v136_v32 = vpop.xlane.xlu1 %135 }
 0x2a2   :  { %v137_v15 = vrot.slane %v136_v32, 4 }
 0x2a4   :  { %v138_v33 = vadd.f32 %v137_v15, %v136_v32 }
 0x2a6   :  { %v139_v34 = vrot.slane %v138_v33, 2 }
 0x2a8   :  { %v140_v35 = vadd.f32 %v139_v34, %v138_v33 }
 0x2aa   :  { %v141_v36 = vrot.slane %v140_v35, 1 }
 0x2ac   :  { %v142_v37 = vadd.f32 %v141_v36, %v140_v35 }
 0x2ae   :  { %162 = vpush %v142_v37 }
 0x2df   :  { %s163_s0 = spop %162 }
 0x2e0   :  { %s144_s2 = smul.f32 0.125, %s163_s0 }
 0x2e2   :  { %146 = sst [smem:[#allocation2]] %s144_s2 }
 0x2e3   :  { %195 = shalt.err (!%p192_p2)
}
 0x2e4   :  { %s202_s24 = smov [#allocation2]  }
 0x2e5   :  { %154 = dma.smem_to_hbm %s202_s24, 16, %s252_s3, [#allocation3]  }
 0x2e6   :  { %196 = dma.done.wait [#allocation3], 16  }
 0x2e7   :  { %197 = vsyncadd [#allocation3], 4294967280 }
 0x2e8   :  { %158 = sfence }
 0x2e9   :  { %159 = vsyncpa [#allocation3], 1 }

</bundles_post_ra>
